<compile_context>
chip_gen: v7x
topology: tpu7x:2x2x1
jax: 0.10.0
libtpu: 0.0.40
codegen_flags: <defaults>
</compile_context>

<pallas_src>
import functools

import numpy as np

import jax
import jax.numpy as jnp
from jax.experimental import pallas as pl
from jax.experimental.pallas import tpu as pltpu

_MIB = 1 << 20
_LANES = 128


# ------------------------------------------------------------------ small helpers

def _round_up(v, q):
    return -(-v // q) * q


def _largest_divisor_leq(n, cap):
    cap = max(1, min(n, cap))
    for t in range(cap, 0, -1):
        if n % t == 0:
            return t
    return 1


def _largest_128_divisor_leq(c, cap):
    best = None
    for ct in range(_LANES, min(c, cap) + 1, _LANES):
        if c % ct == 0:
            best = ct
    return best


@functools.lru_cache(maxsize=None)
def _device_kind():
    try:
        return jax.devices()[0].device_kind.lower().replace(" ", "")
    except Exception:
        return ""


@functools.lru_cache(maxsize=None)
def _vmem_capacity_bytes():
    try:
        cap = int(getattr(pltpu.get_tpu_info(), "vmem_capacity_bytes", 0) or 0)
        if cap > 0:
            return cap
    except Exception:
        pass
    kind = _device_kind()
    if "v7" in kind or "7x" in kind:
        return 64 * _MIB
    return 128 * _MIB


@functools.lru_cache(maxsize=None)
def _num_tensorcores():
    kind = _device_kind()
    if any(t in kind for t in ("v7", "7x", "v4", "v5p")):
        return 2
    return 1


def _budgets():
    """(max input-block bytes, vmem_limit cap) scaled to this generation's VMEM."""
    if _vmem_capacity_bytes() <= 80 * _MIB:      # v7x-class: 64 MiB per TensorCore
        return 4 * _MIB, 32 * _MIB
    return 8 * _MIB, 64 * _MIB                   # v5e / v6e: 128 MiB VMEM


def _ps_all_two(ps):
    """True iff ps is concrete (not traced) and every channel exponent is exactly 2."""
    try:
        arr = np.asarray(ps)
    except Exception:                            # traced under jit -> general pow path
        return False
    return arr.size > 0 and bool(np.all(arr == 2.0))


# ------------------------------------------------------------------ kernels

def _gem_spatial_kernel(x_ref, ps_ref, inv_ps_ref, o_ref, acc_ref, *,
                        eps, inv_hw, hw, t_hw, lanes, use_p2, needs_mask):
    """Grid = (batch tiles, channel tiles, spatial tiles); spatial is the reduction axis.

    x_ref      : (tB, Ct, tHW)   input tile (channels on sublanes, spatial on lanes)
    ps_ref     : (Ct, 1)         per-channel exponent (unused on the p==2 fast path)
    inv_ps_ref : (1, Ct)         hoisted 1/ps for the final root (unused on p==2 path)
    o_ref      : (tB, Ct)        output tile, resident across the spatial axis
    acc_ref    : (tB, Ct, lanes) f32 per-lane partial sums (deferred cross-lane reduce)
    """
    s = pl.program_id(2)

    @pl.when(s == 0)
    def _init():
        acc_ref[...] = jnp.zeros_like(acc_ref)

    x = x_ref[...].astype(jnp.float32)
    if needs_mask:
        # The last spatial block may run past HW (Pallas pads it with garbage): make the
        # padded lanes benign before pow (avoid nan/inf) and zero their contribution.
        j = jax.lax.broadcasted_iota(jnp.int32, x.shape, 2)
        valid = (s * t_hw + j) < hw
        xc = jnp.where(valid, jnp.maximum(x, eps), 1.0)
    else:
        xc = jnp.maximum(x, eps)

    if use_p2:
        hid = xc * xc                                       # VPU: keeps the 1-slot EUP idle
    else:
        ps = ps_ref[...].astype(jnp.float32)[None, :, :]    # (1, Ct, 1)
        hid = jnp.power(xc, ps)                             # exp(p*log x) on the EUP

    if needs_mask:
        hid = jnp.where(valid, hid, 0.0)

    # Fold 128-lane groups with VPU adds; the expensive cross-lane reduce is deferred to
    # the single finalize step of each (batch, channel) block.
    acc = acc_ref[...]
    for g in range(t_hw // lanes):
        acc = acc + hid[:, :, g * lanes:(g + 1) * lanes]
    acc_ref[...] = acc

    @pl.when(s == pl.num_programs(2) - 1)
    def _finalize():
        pooled = jnp.sum(acc_ref[...], axis=-1) * inv_hw    # one XLU reduce per block
        if use_p2:
            out = jnp.sqrt(pooled)
        else:
            out = jnp.power(pooled, inv_ps_ref[...].astype(jnp.float32))
        o_ref[...] = out.astype(o_ref.dtype)


def _gem_small_hw_kernel(x_ref, ps_ref, inv_ps_ref, o_ref, *, eps, inv_hw, use_p2):
    """HW < 128 layout: x_ref is (tB, HW, Ct) with channels on the 128-lane axis."""
    x = x_ref[...].astype(jnp.float32)
    xc = jnp.maximum(x, eps)
    if use_p2:
        hid = xc * xc
    else:
        ps = ps_ref[...].astype(jnp.float32)[None, :, :]    # (1, 1, Ct)
        hid = jnp.power(xc, ps)
    pooled = jnp.sum(hid, axis=1) * inv_hw                  # sublane reduce -> (tB, Ct)
    if use_p2:
        out = jnp.sqrt(pooled)
    else:
        out = jnp.power(pooled, inv_ps_ref[...].astype(jnp.float32))
    o_ref[...] = out.astype(o_ref.dtype)


# ------------------------------------------------------------------ wrappers

def _gem_spatial(x_nchw, ps, eps, use_p2, spatial_tile_cap):
    n, C, H, W = x_nchw.shape
    HW = H * W
    itemsize = jnp.dtype(x_nchw.dtype).itemsize
    max_block, limit_cap = _budgets()

    x3 = x_nchw.reshape(n, C, HW)                  # free reshape; no transpose
    ps_f32 = ps.astype(jnp.float32)
    ps_col = ps_f32.reshape(C, 1)                  # broadcasts over lanes in-kernel
    inv_ps_row = (1.0 / ps_f32).reshape(1, C)      # hoisted reciprocal for the final root

    # Tiles: batch <= 8, channels 128-256 (or full C when C has no 128-multiple divisor;
    # extremely large non-tileable C may exceed the block budget in that fallback).
    tB = _largest_divisor_leq(n, 8)
    if C % 256 == 0:
        Ct = 256
    elif C % 128 == 0:
        Ct = 128
    else:
        Ct = C

    # Multi-TensorCore chips: keep >= 2 blocks on the "parallel" axes for megacore.
    if _num_tensorcores() >= 2 and tB == n and Ct == C:
        if n > 1:
            tB = _largest_divisor_leq(n, n // 2)
        elif C % 256 == 0:
            Ct = C // 2
        elif C % 128 == 0 and C > 128:
            Ct = 128

    while tB > 1 and tB * Ct * _LANES * itemsize > max_block:
        tB = _largest_divisor_leq(n, tB - 1)

    # Spatial tile: the contiguous HBM axis -- grow it first (multiple of 128, capped by
    # the block budget and spatial_tile_cap), or take the full HW when that fits.
    budget_thw = max(_LANES, (max_block // (tB * Ct * itemsize)) // _LANES * _LANES)
    desired = min(budget_thw, _round_up(HW, _LANES), max(_LANES, int(spatial_tile_cap)))
    t_hw = HW if desired >= HW else desired
    lanes = _LANES if t_hw % _LANES == 0 else t_hw   # latter only when t_hw == HW
    needs_mask = (HW % t_hw) != 0

    grid = (n // tB, C // Ct, -(-HW // t_hw))

    # VMEM sizing from what actually lives there: double-buffered input blocks, the f32
    # upcast/pow intermediates, the per-lane accumulator, output and scalar blocks.
    in_block = tB * Ct * t_hw * itemsize
    f32_block = tB * Ct * t_hw * 4
    acc_bytes = tB * Ct * lanes * 4
    out_bytes = tB * Ct * itemsize
    need = 2 * in_block + 2 * f32_block + acc_bytes + 4 * out_bytes + 2 * _MIB
    vmem_limit = int(max(16 * _MIB, min(limit_cap, need)))

    kernel = functools.partial(
        _gem_spatial_kernel, eps=float(eps), inv_hw=1.0 / float(HW), hw=HW,
        t_hw=t_hw, lanes=lanes, use_p2=use_p2, needs_mask=needs_mask)

    return pl.pallas_call(
        kernel,
        out_shape=jax.ShapeDtypeStruct((n, C), x_nchw.dtype),
        grid_spec=pltpu.PrefetchScalarGridSpec(
            num_scalar_prefetch=0,
            grid=grid,
            in_specs=[
                pl.BlockSpec((tB, Ct, t_hw), lambda b, c, s: (b, c, s)),
                pl.BlockSpec((Ct, 1), lambda b, c, s: (c, 0)),
                pl.BlockSpec((1, Ct), lambda b, c, s: (0, c)),
            ],
            out_specs=pl.BlockSpec((tB, Ct), lambda b, c, s: (b, c)),
            scratch_shapes=[pltpu.VMEM((tB, Ct, lanes), jnp.float32)],
        ),
        compiler_params=pltpu.CompilerParams(
            dimension_semantics=("parallel", "parallel", "arbitrary"),
            vmem_limit_bytes=vmem_limit,
        ),
    )(x3, ps_col, inv_ps_row)


def _gem_small_hw(x_nchw, ps, eps, use_p2):
    n, C, H, W = x_nchw.shape
    HW = H * W
    itemsize = jnp.dtype(x_nchw.dtype).itemsize
    max_block, limit_cap = _budgets()

    # One-off transpose so channels ride the 128-lane axis and HW sits on sublanes; with
    # HW < 128 the NCHW layout would waste most lanes and DMA tiny strided rows.
    x_t = jnp.transpose(x_nchw.reshape(n, C, HW), (0, 2, 1))   # (N, HW, C)
    ps_f32 = ps.astype(jnp.float32)
    ps_row = ps_f32.reshape(1, C)
    inv_ps_row = (1.0 / ps_f32).reshape(1, C)

    tB = _largest_divisor_leq(n, 8)
    if C % 128 == 0:
        max_ct = max(_LANES, max_block // max(1, tB * HW * itemsize))
        Ct = _largest_128_divisor_leq(C, max_ct) or _LANES
    else:
        Ct = C
    while tB > 1 and tB * HW * Ct * itemsize > max_block:
        tB = _largest_divisor_leq(n, tB - 1)

    # Multi-TensorCore chips: keep >= 2 parallel blocks so both cores get work.
    if _num_tensorcores() >= 2 and tB == n and Ct == C:
        if n > 1:
            tB = _largest_divisor_leq(n, n // 2)
        elif C % 256 == 0:
            Ct = C // 2
        elif C % 128 == 0 and C > 128:
            Ct = _LANES

    grid = (n // tB, C // Ct)

    in_block = tB * HW * Ct * itemsize
    need = 2 * in_block + 2 * tB * HW * Ct * 4 + 4 * tB * Ct * itemsize + 2 * _MIB
    vmem_limit = int(max(16 * _MIB, min(limit_cap, need)))

    kernel = functools.partial(_gem_small_hw_kernel, eps=float(eps),
                               inv_hw=1.0 / float(HW), use_p2=use_p2)
    return pl.pallas_call(
        kernel,
        out_shape=jax.ShapeDtypeStruct((n, C), x_nchw.dtype),
        grid_spec=pltpu.PrefetchScalarGridSpec(
            num_scalar_prefetch=0,
            grid=grid,
            in_specs=[
                pl.BlockSpec((tB, HW, Ct), lambda b, c: (b, 0, c)),
                pl.BlockSpec((1, Ct), lambda b, c: (0, c)),
                pl.BlockSpec((1, Ct), lambda b, c: (0, c)),
            ],
            out_specs=pl.BlockSpec((tB, Ct), lambda b, c: (b, c)),
        ),
        compiler_params=pltpu.CompilerParams(
            dimension_semantics=("parallel", "parallel"),
            vmem_limit_bytes=vmem_limit,
        ),
    )(x_t, ps_row, inv_ps_row)


def channelwise_gem(x_nchw, ps, eps=1e-6, *, spatial_tile_cap=2048):
    """GeM pooling with per-channel exponents. x: (N, C, H, W), ps: (C,). Returns (N, C)."""
    _, C, H, W = x_nchw.shape
    assert ps.shape == (C,), (ps.shape, C)
    use_p2 = _ps_all_two(ps)    # the module's default init (p=2) -> VPU square + sqrt
    if H * W < _LANES:
        return _gem_small_hw(x_nchw, ps, eps, use_p2)
    return _gem_spatial(x_nchw, ps, eps, use_p2, spatial_tile_cap)


def channelwise_gem_ref(x_nchw, ps, eps=1e-6):
    """Pure-JAX reference matching the PyTorch forward exactly."""
    n, C, H, W = x_nchw.shape
    bi = jnp.transpose(x_nchw, (0, 3, 2, 1)).reshape(n * H * W, C)
    hid = jnp.power(jnp.maximum(bi, eps), ps)     # torch clamp(min=eps).pow(ps)
    pooled = hid.reshape(n, H * W, C).mean(axis=1)
    return jnp.power(pooled, 1.0 / ps)


if __name__ == "__main__":
    eps = 1e-6
    key = jax.random.PRNGKey(0)

    # (N, C, H, W) test shapes:
    #   main path: small HW / full-HW single block / masked ragged spatial tiling,
    #   small-HW path: lane-dense channels (C%128==0) / odd channel count.
    shapes = [(2, 4, 16, 16), (2, 8, 32, 32), (2, 4, 48, 48), (2, 640, 2, 2), (3, 5, 7, 9)]
    for i, (N, C, H, W) in enumerate(shapes):
        k = jax.random.fold_in(key, i)
        x = jax.random.normal(k, (N, C, H, W), dtype=jnp.float32)

        # p == 2 everywhere (nn.Parameter(torch.ones(dim) * 2)) -> VPU fast path.
        ps2 = jnp.full((C,), 2.0, dtype=jnp.float32)
        out = jax.block_until_ready(channelwise_gem(x, ps2, eps))
        ref = channelwise_gem_ref(x, ps2, eps)
        assert out.shape == (N, C), (out.shape, (N, C))
        assert jnp.allclose(out, ref, rtol=1e-4, atol=1e-5), ("p2", N, C, H, W)

        # Learned, non-integer per-channel exponents -> general pow path.
        psg = 1.5 + jax.random.uniform(jax.random.fold_in(k, 1), (C,), dtype=jnp.float32)
        outg = jax.block_until_ready(channelwise_gem(x, psg, eps))
        refg = channelwise_gem_ref(x, psg, eps)
        assert jnp.allclose(outg, refg, rtol=1e-4, atol=1e-5), ("gen", N, C, H, W)

    print("KERNEL_OK")
</pallas_src>

<mosaic_0001>
module attributes {stable_mosaic.version = 11 : i64} {
  func.func @_gem_spatial_kernel(%arg0: i32, %arg1: i32, %arg2: i32, %arg3: memref<2x4x256xf32, #tpu.memory_space<vmem>>, %arg4: memref<4x1xf32, #tpu.memory_space<vmem>>, %arg5: memref<1x4xf32, #tpu.memory_space<vmem>>, %arg6: memref<2x4xf32, #tpu.memory_space<vmem>>, %arg7: memref<2x4x128xf32, #tpu.memory_space<vmem>>) attributes {dimension_semantics = [#tpu.dimension_semantics<parallel>, #tpu.dimension_semantics<parallel>, #tpu.dimension_semantics<arbitrary>], iteration_bounds = array<i64: 1, 1, 1>, scalar_prefetch = 0 : i64, scratch_operands = 1 : i64, tpu.core_type = #tpu.core_type<tc>, window_params = [{transform_indices = @transform_0, window_bounds = array<i64: 2, 4, 256>}, {transform_indices = @transform_1, window_bounds = array<i64: 4, 1>}, {transform_indices = @transform_2, window_bounds = array<i64: 1, 4>}, {transform_indices = @transform_3, window_bounds = array<i64: 2, 4>}]} {
    %c0_i32 = arith.constant 0 : i32
    %0 = arith.cmpi eq, %arg2, %c0_i32 : i32
    %1 = arith.extui %0 : i1 to i32
    %c0_i32_0 = arith.constant 0 : i32
    %2 = arith.cmpi ne, %1, %c0_i32_0 : i32
    scf.if %2 {
      %cst_11 = arith.constant 0.000000e+00 : f32
      %16 = vector.broadcast %cst_11 : f32 to vector<2x4x128xf32>
      %c0_12 = arith.constant 0 : index
      %c0_13 = arith.constant 0 : index
      %c0_14 = arith.constant 0 : index
      %17 = vector.load %arg7[%c0_12, %c0_13, %c0_14] : memref<2x4x128xf32, #tpu.memory_space<vmem>>, vector<2x4x128xf32>
      tpu.vector_store %arg7[%c0_12, %c0_13, %c0_14], %16 {strides = array<i32>} : memref<2x4x128xf32, #tpu.memory_space<vmem>>, vector<2x4x128xf32>,
    } else {
    }
    %c0 = arith.constant 0 : index
    %c0_1 = arith.constant 0 : index
    %c0_2 = arith.constant 0 : index
    %3 = vector.load %arg3[%c0, %c0_1, %c0_2] : memref<2x4x256xf32, #tpu.memory_space<vmem>>, vector<2x4x256xf32>
    %cst = arith.constant 9.99999997E-7 : f32
    %4 = vector.broadcast %cst : f32 to vector<2x4x256xf32>
    %5 = arith.maximumf %3, %4 : vector<2x4x256xf32>
    %6 = arith.mulf %5, %5 : vector<2x4x256xf32>
    %c0_3 = arith.constant 0 : index
    %c0_4 = arith.constant 0 : index
    %c0_5 = arith.constant 0 : index
    %7 = vector.load %arg7[%c0_3, %c0_4, %c0_5] : memref<2x4x128xf32, #tpu.memory_space<vmem>>, vector<2x4x128xf32>
    %8 = vector.extract_strided_slice %6 {offsets = [0, 0, 0], sizes = [2, 4, 128], strides = [1, 1, 1]} : vector<2x4x256xf32> to vector<2x4x128xf32>
    %9 = arith.addf %7, %8 : vector<2x4x128xf32>
    %10 = vector.extract_strided_slice %6 {offsets = [0, 0, 128], sizes = [2, 4, 128], strides = [1, 1, 1]} : vector<2x4x256xf32> to vector<2x4x128xf32>
    %11 = arith.addf %9, %10 : vector<2x4x128xf32>
    %c0_6 = arith.constant 0 : index
    %c0_7 = arith.constant 0 : index
    %c0_8 = arith.constant 0 : index
    %12 = vector.load %arg7[%c0_6, %c0_7, %c0_8] : memref<2x4x128xf32, #tpu.memory_space<vmem>>, vector<2x4x128xf32>
    tpu.vector_store %arg7[%c0_6, %c0_7, %c0_8], %11 {strides = array<i32>} : memref<2x4x128xf32, #tpu.memory_space<vmem>>, vector<2x4x128xf32>,
    %c0_i32_9 = arith.constant 0 : i32
    %13 = arith.cmpi eq, %arg2, %c0_i32_9 : i32
    %14 = arith.extui %13 : i1 to i32
    %c0_i32_10 = arith.constant 0 : i32
    %15 = arith.cmpi ne, %14, %c0_i32_10 : i32
    scf.if %15 {
      %c0_11 = arith.constant 0 : index
      %c0_12 = arith.constant 0 : index
      %c0_13 = arith.constant 0 : index
      %16 = vector.load %arg7[%c0_11, %c0_12, %c0_13] : memref<2x4x128xf32, #tpu.memory_space<vmem>>, vector<2x4x128xf32>
      %cst_14 = arith.constant dense<0.000000e+00> : vector<2x4xf32>
      %17 = vector.multi_reduction <add>, %16, %cst_14 [2] : vector<2x4x128xf32> to vector<2x4xf32>
      %cst_15 = arith.constant 3.906250e-03 : f32
      %18 = vector.broadcast %cst_15 : f32 to vector<2x4xf32>
      %19 = arith.mulf %17, %18 : vector<2x4xf32>
      %20 = math.sqrt %19 : vector<2x4xf32>
      %c0_16 = arith.constant 0 : index
      %c0_17 = arith.constant 0 : index
      %21 = vector.load %arg6[%c0_16, %c0_17] : memref<2x4xf32, #tpu.memory_space<vmem>>, vector<2x4xf32>
      tpu.vector_store %arg6[%c0_16, %c0_17], %20 {strides = array<i32>} : memref<2x4xf32, #tpu.memory_space<vmem>>, vector<2x4xf32>,
    } else {
    }
    return
  }
  func.func @transform_0(%arg0: i32, %arg1: i32, %arg2: i32) -> (i32, i32, i32) {
    %c0_i32 = arith.constant 0 : i32
    return %arg0, %arg1, %arg2 : i32, i32, i32
  }
  func.func @transform_1(%arg0: i32, %arg1: i32, %arg2: i32) -> (i32, i32) {
    %c0_i32 = arith.constant 0 : i32
    %c0_i32_0 = arith.constant 0 : i32
    return %arg1, %c0_i32 : i32, i32
  }
  func.func @transform_2(%arg0: i32, %arg1: i32, %arg2: i32) -> (i32, i32) {
    %c0_i32 = arith.constant 0 : i32
    %c0_i32_0 = arith.constant 0 : i32
    return %c0_i32, %arg1 : i32, i32
  }
  func.func @transform_3(%arg0: i32, %arg1: i32, %arg2: i32) -> (i32, i32) {
    %c0_i32 = arith.constant 0 : i32
    return %arg0, %arg1 : i32, i32
  }
}

</mosaic_0001>

<bundles_post_ra>
// kernel: tpu_custom_call.1
= control target key start
LH: loop header
LB: loop body
LE: loop exit
PB: predicated region body
PF: predicated region fallthrough
CT: control target
= control target key end

     0   :  { %8 = vsyncpa [#allocation4], 0  ;;  %s221_s0 = inlined_call_operand.hbm [shape: f32[2,4,256], index: 0, kind: input, shape index: {}]   ;;  %s222_s1 = inlined_call_operand.vmem [shape: f32[4,1], index: 1, kind: input, shape index: {}]   ;;  %s223_s2 = inlined_call_operand.vmem [shape: f32[1,4], index: 2, kind: input, shape index: {}]   ;;  %s224_s3 = inlined_call_operand.hbm [shape: f32[2,4], index: 3, kind: output, shape index: {}]  }
   0x1   :  { %9 = vsyncpa [#allocation5], 0  ;;  %s172_s12 = smov [#allocation3]   ;;  %s124_s16 = scalar_lea.hbm %s221_s0, 256 }
   0x2   :  { %s15_s13 = sshll.u32 %s172_s12, 4  ;;  %p125_p0 = scmp.ne.s32.totalorder %s221_s0, %s124_s16  ;;  %s16_s13 = int_to_ptr.vmem [resolvable:$true] %s15_s13 }
   0x3   :  { %p128_p1 = scmp.lt.u32.totalorder %s124_s16, %s221_s0 }
   0x5   :  { %p130_p2 = pnand %p128_p1, %p125_p0 }
   0x7   :  { %133 = shalt.err (!%p130_p2)
}
   0x8   :  { %s134_s2 = scalar_lea.vmem %s16_s13, 256  ;;  %p139_p4 = scmp.lt.s32.totalorder %s16_s13, %s16_s13 }
   0x9   :  { %p135_p3 = scmp.ne.s32.totalorder %s16_s13, %s134_s2  ;;  %p140_p5 = scmp.lt.s32.totalorder %s134_s2, %s134_s2 }
   0xb   :  { %p141_p6 = por %p140_p5, %p139_p4 }
   0xd   :  { %p142_p7 = pnand %p141_p6, %p135_p3 }
   0xf   :  { %145 = shalt.err (!%p142_p7)
}
  0x10   :  { %s173_s20 = smov 128   ;;  %s174_s21 = smov 8  }
  0x11   :  { %21 = dma.hbm_to_vmem [thread:$0]  %s221_s0, 256, %s16_s13, [#allocation4], %s173_s20, %s173_s20, %s174_s21  }
  0x12   :  { %168 = dma.done.wait [#allocation4], 256  }
  0x13   :  { %169 = vsyncadd [#allocation4], 4294967040  ;;  %v175_v0 = vmov 0.0   ;;  %v35_v1 = vld [vmem:[#allocation3] sm:$0xff]  ;;  %v36_v2 = vld [vmem:[#allocation3 + $0x8] sm:$0xff]  ;;  %vm60_vm0 = vcmask 1043456   ;;  %v85_v23 = vlaneseq }
  0x14   :  { %33 = vst [vmem:[#allocation2] sm:$0xf] %v175_v0  ;;  %34 = vst [vmem:[#allocation2 + $0x4] sm:$0xf] %v175_v0  ;;  %v37_v3 = vmax.f32 %v35_v1, 1e-06 }
  0x15   :  { %v38_v4 = vmax.f32 %v36_v2, 1e-06  ;;  %v86_v26 = vand.u32 127, %v85_v23  ;;  %v88_v27 = vshrl.u32 %v85_v23, 7  ;;  %s176_s0 = smov [#allocation6]   ;;  %vm95_vm5 = vcmask 1041409  }
  0x16   :  { %v39_v7 = vmul.f32 %v37_v3, %v37_v3  ;;  %s106_s24 = sshll.u32 %s176_s0, 4  ;;  %vm98_vm6 = vcmask 25600   ;;  %s107_s24 = int_to_ptr.vmem [resolvable:$true] %s106_s24 }
  0x17   :  { %v40_v8 = vmul.f32 %v38_v4, %v38_v4  ;;  %v89_v32 = vsub.s32 %v86_v26, %v88_v27  ;;  %s146_s25 = scalar_lea.vmem %s107_s24, 32  ;;  %p151_p9 = scmp.lt.s32.totalorder %s107_s24, %s107_s24 }
  0x18   :  { %v47_v10 = vcombine.high %v39_v7, %v39_v7  ;;  %p147_p8 = scmp.ne.s32.totalorder %s107_s24, %s146_s25  ;;  %p152_p10 = scmp.lt.s32.totalorder %s146_s25, %s146_s25 }
  0x19   :  { %v48_v12 = vcombine.high %v40_v8, %v40_v8 }
  0x1a   :  { %p153_p11 = por %p152_p10, %p151_p9 }
  0x1b   :  { %v41_v5 = vld [vmem:[#allocation2] sm:$0xf]  ;;  %v42_v6 = vld [vmem:[#allocation2 + $0x4] sm:$0xf] }
  0x1c   :  { %v43_v9 = vadd.f32 %v41_v5, %v39_v7  ;;  %v44_v11 = vadd.f32 %v42_v6, %v40_v8  ;;  %p154_p12 = pnand %p153_p11, %p147_p8 }
  0x1e   :  { %v51_v13 = vadd.f32 %v47_v10, %v43_v9  ;;  %v52_v14 = vadd.f32 %v48_v12, %v44_v11 }
  0x20   :  { %53 = vst [vmem:[#allocation2] sm:$0xf] %v51_v13  ;;  %54 = vst [vmem:[#allocation2 + $0x4] sm:$0xf] %v52_v14 }
  0x27   :  { %v58_v15 = vld [vmem:[#allocation2] sm:$0xf]  ;;  %v59_v16 = vld [vmem:[#allocation2 + $0x4] sm:$0xf] }
  0x28   :  { %v61_v17 = vsel %vm60_vm0, %v58_v15, 0.0  ;;  %v64_v18 = vsel %vm60_vm0, %v59_v16, 0.0 }
  0x29   :  { %62 = vadd.xlane.f32.xlu0 %v61_v17 }
  0x2d   :  { %65 = vadd.xlane.f32.xlu0 %v64_v18 }
  0xb6   :  { %v63_v19 = vpop.xlane.xlu0 %62 }
  0xb7   :  { %v67_v20 = vmul.f32 0.00390625, %v63_v19 }
  0xb9   :  { %120 = vrsqrt.f32 %v67_v20  ;;  %vm71_vm1 = vcmp.eq.f32.partialorder %v67_v20, inf  ;;  %v74_v30 = vand.u32 2147483648, %v67_v20  ;;  %vm73_vm2 = vcmp.eq.f32.partialorder %v67_v20, 0.0 }
  0xba   :  { %v66_v21 = vpop.xlane.xlu0 %65 }
  0xbb   :  { %v68_v22 = vmul.f32 0.00390625, %v66_v21 }
  0xbd   :  { %122 = vrsqrt.f32 %v68_v22  ;;  %vm78_vm3 = vcmp.eq.f32.partialorder %v68_v22, inf  ;;  %v81_v34 = vand.u32 2147483648, %v68_v22  ;;  %vm80_vm4 = vcmp.eq.f32.partialorder %v68_v22, 0.0 }
  0xc3   :  { %v121_v24 = vpop.eup %120 }
  0xc4   :  { %v70_v25 = vmul.f32 %v121_v24, %v67_v20 }
  0xc6   :  { %v72_v28 = vsel %vm71_vm1, %v67_v20, %v70_v25 }
  0xc7   :  { %v123_v29 = vpop.eup %122  ;;  %v75_v33 = vsel %vm73_vm2, %v74_v30, %v72_v28 }
  0xc8   :  { %v77_v31 = vmul.f32 %v123_v29, %v68_v22  ;;  %v90_v37 = vrot.slane %v75_v33, %v89_v32 }
  0xca   :  { %v79_v35 = vsel %vm78_vm3, %v68_v22, %v77_v31 }
  0xcb   :  { %v82_v36 = vsel %vm80_vm4, %v81_v34, %v79_v35 }
  0xcc   :  { %v94_v38 = vrot.slane %v82_v36, %v89_v32 }
  0xce   :  { %v96_v39 = vsel %vm95_vm5, %v94_v38, %v90_v37 }
  0xcf   :  { %99 = vst.msk [vmem:[#allocation6] sm:$0x3] %vm98_vm6, %v96_v39 }
  0xd0   :  { %157 = shalt.err (!%p154_p12)
}
  0xd1   :  { %s158_s28 = scalar_lea.hbm %s224_s3, 32 }
  0xd2   :  { %p159_p13 = scmp.ne.s32.totalorder %s224_s3, %s158_s28  ;;  %p162_p0 = scmp.lt.u32.totalorder %s158_s28, %s224_s3 }
  0xd4   :  { %p164_p1 = pnand %p162_p0, %p159_p13 }
  0xd6   :  { %167 = shalt.err (!%p164_p1)
}
  0xd7   :  { %109 = dma.vmem_to_hbm [thread:$0]  %s107_s24, 32, %s224_s3, [#allocation5]  }
  0xd8   :  { %170 = dma.done.wait [#allocation5], 32  }
  0xd9   :  { %171 = vsyncadd [#allocation5], 4294967264 }
  0xda   :  { %113 = vsyncpa [#allocation4], 1 }
  0xdb   :  { %114 = vsyncpa [#allocation5], 1 }

</bundles_post_ra>
